<compile_context>
chip_gen: v7x
topology: tpu7x:2x2x1
jax: 0.10.0
libtpu: 0.0.40
codegen_flags: <defaults>
</compile_context>

<pallas_src>
import functools

import jax
import jax.numpy as jnp
from jax.experimental import pallas as pl
from jax.experimental.pallas import tpu as pltpu


# ---------------------------------------------------------------------------
# Fused kernel: conv1+BN1+ReLU -> conv2+BN2 -> SE -> residual -> ReLU
# ---------------------------------------------------------------------------
def basic_block_se_kernel(x_ref, w1_ref, w2_ref, p_ref, o_ref, *, H, W):
    # x_ref : (1, Cin, LW) f32 — channel-major, H-padded image flattened along lanes:
    #         lane 0 is a zero guard, padded row r lives at lanes [1+r*W, 1+(r+1)*W),
    #         lanes beyond 1+(H+2)*W are zero.  (W-padding is virtual, see masks.)
    # w1_ref: (C, 9*Cin) bf16, columns ordered (kh, kw, cin)
    # w2_ref: (C, 9*C)   bf16
    # p_ref : (C, 4+2*Cr) f32 packed [s1 | b1 | s2 | b2 | se_w1.T | se_w2]
    # o_ref : (1, C, HW) f32 channel-major output (lane-dense: HW multiple of 128)
    HW = H * W
    C = o_ref.shape[1]
    Cr = (p_ref.shape[1] - 4) // 2
    f32, bf16 = jnp.float32, jnp.bfloat16

    # Virtual W-padding masks (computed once): taps with kw==0 must see zero at the
    # w==0 output columns, taps with kw==2 at the w==W-1 columns.
    col = jax.lax.broadcasted_iota(jnp.int32, (1, HW), 1) % W
    mask_l = col != 0        # apply for kw == 0
    mask_r = col != (W - 1)  # apply for kw == 2

    def conv3x3(buf, w):
        # buf: (cin, >= HW+2*W+2) f32 flat H-padded channel-major image (layout above)
        # w:   (C, 9*cin) bf16.  Returns (C, HW) f32.
        slabs = []
        for kh in range(3):
            for kw in range(3):
                off = kh * W + kw
                s = buf[:, off:off + HW]                       # (cin, HW) lane slice
                if kw == 0:
                    s = jnp.where(mask_l, s, 0.0)
                elif kw == 2:
                    s = jnp.where(mask_r, s, 0.0)
                slabs.append(s.astype(bf16))
        patchesT = jnp.concatenate(slabs, axis=0)              # (9*cin, HW), sublane concat
        return jnp.dot(w, patchesT, preferred_element_type=f32)  # MXU: N = HW = 256

    # Packed per-channel parameters (one DMA).
    p = p_ref[...]
    s1, b1 = p[:, 0:1], p[:, 1:2]
    s2, b2 = p[:, 2:3], p[:, 3:4]
    se1 = p[:, 4:4 + Cr]              # se_w1.T  (C, Cr)
    se2 = p[:, 4 + Cr:4 + 2 * Cr]     # se_w2    (C, Cr)

    xfull = x_ref[0]                                  # (Cin, LW) f32, VMEM-resident
    identity = xfull[:, 1 + W:1 + W + HW]             # un-padded input, (Cin, HW) f32

    # ---- conv1 (single K=9*Cin bf16 matmul, f32 acc) + BN1 + ReLU1
    y1 = jnp.maximum(conv3x3(xfull, w1_ref[...]) * s1 + b1, 0.0)      # (C, HW)

    # ---- re-pad y1 in registers exactly like x: [guard+top row | data | bottom row+guard]
    zpad = jnp.zeros((C, W + 1), f32)
    yfull = jnp.concatenate([zpad, y1, zpad], axis=1)                 # (C, HW+2W+2)

    # ---- conv2 (single K=9*C bf16 matmul) + BN2 (no ReLU yet)
    out2 = conv3x3(yfull, w2_ref[...]) * s2 + b2                      # (C, HW)

    # ---- Squeeze-and-Excitation: avgpool -> fc1 -> relu -> fc2 -> sigmoid.
    #      Tiny FCs as VPU/XLU broadcast-multiply + reductions (not worth the MXU).
    pooled = jnp.sum(out2, axis=1, keepdims=True) * (1.0 / HW)        # (C, 1)
    hidden = jnp.maximum(jnp.sum(se1 * pooled, axis=0, keepdims=True), 0.0)   # (1, Cr)
    gates = jax.nn.sigmoid(jnp.sum(se2 * hidden, axis=1, keepdims=True))      # (C, 1)

    # ---- gate, residual add (identity from the already-resident input), ReLU2
    o_ref[0] = jnp.maximum(out2 * gates + identity, 0.0).astype(o_ref.dtype)


# ---------------------------------------------------------------------------
# JAX wrapper
# ---------------------------------------------------------------------------
def basic_block_se(x, params, eps=1e-5):
    """Fused BasicBlock_SE forward. x: (B, C, H, W) float32 NCHW (PyTorch layout)."""
    B, Cin, H, W = x.shape
    C = params["w1"].shape[0]
    Cr = params["se_w1"].shape[0]
    assert Cin == C, "stride=1 / downsample=None block requires inplanes == planes"
    HW = H * W
    f32, bf16 = jnp.float32, jnp.bfloat16

    # Fold inference-mode BatchNorm into per-channel scale/bias.
    def fold_bn(g, b, m, v):
        s = g / jnp.sqrt(v + eps)
        return s.astype(f32), (b - m * s).astype(f32)

    s1, b1 = fold_bn(params["bn1_gamma"], params["bn1_beta"],
                     params["bn1_mean"], params["bn1_var"])
    s2, b2 = fold_bn(params["bn2_gamma"], params["bn2_beta"],
                     params["bn2_mean"], params["bn2_var"])

    # Conv weights: OIHW -> (cout, kh, kw, cin) -> (C, 9*Cin), bf16 for the MXU.
    # Column order (kh, kw, cin) matches the kernel's patchesT row order.
    w1t = jnp.transpose(params["w1"], (0, 2, 3, 1)).reshape(C, 9 * Cin).astype(bf16)
    w2t = jnp.transpose(params["w2"], (0, 2, 3, 1)).reshape(C, 9 * C).astype(bf16)

    # Pack all tiny per-channel parameters into ONE (C, 4+2*Cr) f32 slab.
    pslab = jnp.zeros((C, 4 + 2 * Cr), f32)
    pslab = pslab.at[:, 0].set(s1).at[:, 1].set(b1).at[:, 2].set(s2).at[:, 3].set(b2)
    pslab = pslab.at[:, 4:4 + Cr].set(params["se_w1"].T.astype(f32))          # (C, Cr)
    pslab = pslab.at[:, 4 + Cr:4 + 2 * Cr].set(params["se_w2"].astype(f32))   # (C, Cr)

    # Channel-major, H-padded, lane-flattened image with a 1-lane left guard.
    # Only activation tensor DMA'd in; lane width rounded up to a multiple of 128.
    need = HW + 2 * W + 2                       # max lane index ever read (exclusive)
    LW = ((need + 127) // 128) * 128
    xbuf = jnp.zeros((B, Cin, LW), f32)
    xbuf = xbuf.at[:, :, 1 + W:1 + W + HW].set(x.reshape(B, Cin, HW).astype(f32))

    out = pl.pallas_call(
        functools.partial(basic_block_se_kernel, H=H, W=W),
        out_shape=jax.ShapeDtypeStruct((B, C, HW), f32),
        grid=(B,),
        in_specs=[
            pl.BlockSpec((1, Cin, LW), lambda b: (b, 0, 0)),
            pl.BlockSpec((C, 9 * Cin), lambda b: (0, 0)),
            pl.BlockSpec((C, 9 * C), lambda b: (0, 0)),
            pl.BlockSpec((C, 4 + 2 * Cr), lambda b: (0, 0)),
        ],
        out_specs=pl.BlockSpec((1, C, HW), lambda b: (b, 0, 0)),
        compiler_params=pltpu.CompilerParams(dimension_semantics=("parallel",)),
    )(xbuf, w1t, w2t, pslab)

    # (B, C, HW) channel-major -> (B, C, H, W): a pure reshape, no transpose needed.
    return out.reshape(B, C, H, W)


# ---------------------------------------------------------------------------
# Pure-JAX (f32) reference for validation — mirrors the PyTorch forward exactly.
# ---------------------------------------------------------------------------
def reference(x, params, eps=1e-5):
    dn = ("NCHW", "OIHW", "NCHW")

    def conv(z, w):
        return jax.lax.conv_general_dilated(z, w, (1, 1), ((1, 1), (1, 1)),
                                            dimension_numbers=dn)

    def bn(z, g, b, m, v):
        g, b, m, v = (t[None, :, None, None] for t in (g, b, m, v))
        return (z - m) / jnp.sqrt(v + eps) * g + b

    y = jnp.maximum(bn(conv(x, params["w1"]), params["bn1_gamma"], params["bn1_beta"],
                       params["bn1_mean"], params["bn1_var"]), 0.0)
    z = bn(conv(y, params["w2"]), params["bn2_gamma"], params["bn2_beta"],
           params["bn2_mean"], params["bn2_var"])
    pooled = jnp.mean(z, axis=(2, 3))                        # (B, C)
    h = jnp.maximum(pooled @ params["se_w1"].T, 0.0)         # (B, Cr)
    g = jax.nn.sigmoid(h @ params["se_w2"].T)                # (B, C)
    z = z * g[:, :, None, None]
    return jnp.maximum(z + x, 0.0)


if __name__ == "__main__":
    # inplanes = planes = 16, stride = 1 (no downsample), config = {'reduction': 4}.
    B, C, H, W = 2, 16, 16, 16
    reduction = 4
    Cr = C // reduction

    key = jax.random.PRNGKey(0)
    ks = jax.random.split(key, 13)
    params = {
        "w1": jax.random.normal(ks[0], (C, C, 3, 3), jnp.float32) * 0.1,
        "w2": jax.random.normal(ks[1], (C, C, 3, 3), jnp.float32) * 0.1,
        "bn1_gamma": 1.0 + 0.1 * jax.random.normal(ks[2], (C,), jnp.float32),
        "bn1_beta": 0.1 * jax.random.normal(ks[3], (C,), jnp.float32),
        "bn1_mean": 0.1 * jax.random.normal(ks[4], (C,), jnp.float32),
        "bn1_var": 0.5 + jax.random.uniform(ks[5], (C,), jnp.float32),
        "bn2_gamma": 1.0 + 0.1 * jax.random.normal(ks[6], (C,), jnp.float32),
        "bn2_beta": 0.1 * jax.random.normal(ks[7], (C,), jnp.float32),
        "bn2_mean": 0.1 * jax.random.normal(ks[8], (C,), jnp.float32),
        "bn2_var": 0.5 + jax.random.uniform(ks[9], (C,), jnp.float32),
        # SE FC weights in PyTorch nn.Linear layout: fc1 (Cr, C), fc2 (C, Cr).
        "se_w1": jax.random.normal(ks[10], (Cr, C), jnp.float32) * 0.2,
        "se_w2": jax.random.normal(ks[11], (C, Cr), jnp.float32) * 0.2,
    }
    x = jax.random.normal(ks[12], (B, C, H, W), jnp.float32)

    out = jax.block_until_ready(basic_block_se(x, params))
    ref = jax.block_until_ready(reference(x, params))

    assert out.shape == (B, C, H, W)
    err = float(jnp.max(jnp.abs(out - ref)))
    # bf16 MXU operands (with f32 accumulation) -> relaxed tolerance vs f32 reference.
    assert jnp.allclose(out, ref, rtol=3e-2, atol=3e-2), f"max abs err {err}"
    print("KERNEL_OK")
</pallas_src>

<mosaic_0001>
module attributes {stable_mosaic.version = 11 : i64} {
  func.func @basic_block_se_kernel(%arg0: i32, %arg1: memref<1x16x384xf32, #tpu.memory_space<vmem>>, %arg2: memref<16x144xbf16, #tpu.memory_space<vmem>>, %arg3: memref<16x144xbf16, #tpu.memory_space<vmem>>, %arg4: memref<16x12xf32, #tpu.memory_space<vmem>>, %arg5: memref<1x16x256xf32, #tpu.memory_space<vmem>>) attributes {dimension_semantics = [#tpu.dimension_semantics<parallel>], iteration_bounds = array<i64: 2>, scalar_prefetch = 0 : i64, scratch_operands = 0 : i64, tpu.core_type = #tpu.core_type<tc>, window_params = [{transform_indices = @transform_0, window_bounds = array<i64: 1, 16, 384>}, {pipeline_mode = #tpu.pipeline_mode<synchronous>, transform_indices = @transform_1, window_bounds = array<i64: 16, 144>}, {pipeline_mode = #tpu.pipeline_mode<synchronous>, transform_indices = @transform_2, window_bounds = array<i64: 16, 144>}, {pipeline_mode = #tpu.pipeline_mode<synchronous>, transform_indices = @transform_3, window_bounds = array<i64: 16, 12>}, {transform_indices = @transform_4, window_bounds = array<i64: 1, 16, 256>}]} {
    %0 = tpu.iota {dimensions = array<i32: 1>} : vector<1x256xi32>
    %c16_i32 = arith.constant 16 : i32
    %c0_i32 = arith.constant 0 : i32
    %1 = arith.cmpi eq, %c16_i32, %c0_i32 : i32
    %c1_i32 = arith.constant 1 : i32
    %2 = arith.select %1, %c1_i32, %c16_i32 : i32
    %3 = vector.broadcast %2 : i32 to vector<1x256xi32>
    %4 = arith.remsi %0, %3 : vector<1x256xi32>
    %c0_i32_0 = arith.constant 0 : i32
    %5 = vector.broadcast %c0_i32_0 : i32 to vector<1x256xi32>
    %6 = arith.cmpi ne, %4, %5 : vector<1x256xi32>
    %c0_i32_1 = arith.constant 0 : i32
    %7 = vector.broadcast %c0_i32_1 : i32 to vector<1x256xi32>
    %8 = arith.cmpi slt, %4, %7 : vector<1x256xi32>
    %c0_i32_2 = arith.constant 0 : i32
    %9 = arith.cmpi slt, %2, %c0_i32_2 : i32
    %10 = vector.broadcast %9 : i1 to vector<1x256xi1>
    %11 = vector.broadcast %10 : vector<1x256xi1> to vector<1x256xi1>
    %12 = arith.xori %8, %11 : vector<1x256xi1>
    %13 = arith.andi %12, %6 : vector<1x256xi1>
    %14 = vector.broadcast %2 : i32 to vector<1x256xi32>
    %15 = arith.addi %4, %14 : vector<1x256xi32>
    %16 = arith.select %13, %15, %4 : vector<1x256xi1>, vector<1x256xi32>
    %c0_i32_3 = arith.constant 0 : i32
    %17 = vector.broadcast %c0_i32_3 : i32 to vector<1x256xi32>
    %18 = arith.cmpi ne, %16, %17 : vector<1x256xi32>
    %c15_i32 = arith.constant 15 : i32
    %19 = vector.broadcast %c15_i32 : i32 to vector<1x256xi32>
    %20 = arith.cmpi ne, %16, %19 : vector<1x256xi32>
    %c0 = arith.constant 0 : index
    %c0_4 = arith.constant 0 : index
    %21 = vector.load %arg4[%c0, %c0_4] : memref<16x12xf32, #tpu.memory_space<vmem>>, vector<16x12xf32>
    %22 = vector.extract_strided_slice %21 {offsets = [0, 0], sizes = [16, 1], strides = [1, 1]} : vector<16x12xf32> to vector<16x1xf32>
    %23 = vector.extract_strided_slice %21 {offsets = [0, 1], sizes = [16, 1], strides = [1, 1]} : vector<16x12xf32> to vector<16x1xf32>
    %24 = vector.extract_strided_slice %21 {offsets = [0, 2], sizes = [16, 1], strides = [1, 1]} : vector<16x12xf32> to vector<16x1xf32>
    %25 = vector.extract_strided_slice %21 {offsets = [0, 3], sizes = [16, 1], strides = [1, 1]} : vector<16x12xf32> to vector<16x1xf32>
    %26 = vector.extract_strided_slice %21 {offsets = [0, 4], sizes = [16, 4], strides = [1, 1]} : vector<16x12xf32> to vector<16x4xf32>
    %27 = vector.extract_strided_slice %21 {offsets = [0, 8], sizes = [16, 4], strides = [1, 1]} : vector<16x12xf32> to vector<16x4xf32>
    %c0_5 = arith.constant 0 : index
    %c0_6 = arith.constant 0 : index
    %c0_7 = arith.constant 0 : index
    %28 = vector.load %arg1[%c0_5, %c0_6, %c0_7] : memref<1x16x384xf32, #tpu.memory_space<vmem>>, vector<1x16x384xf32>
    %29 = vector.shape_cast %28 : vector<1x16x384xf32> to vector<16x384xf32>
    %30 = vector.extract_strided_slice %29 {offsets = [0, 17], sizes = [16, 256], strides = [1, 1]} : vector<16x384xf32> to vector<16x256xf32>
    %c0_8 = arith.constant 0 : index
    %c0_9 = arith.constant 0 : index
    %31 = vector.load %arg2[%c0_8, %c0_9] : memref<16x144xbf16, #tpu.memory_space<vmem>>, vector<16x144xbf16>
    %32 = vector.extract_strided_slice %29 {offsets = [0, 0], sizes = [16, 256], strides = [1, 1]} : vector<16x384xf32> to vector<16x256xf32>
    %cst = arith.constant 0.000000e+00 : f32
    %33 = vector.shape_cast %18 : vector<1x256xi1> to vector<1x256xi1>
    %34 = vector.broadcast %33 : vector<1x256xi1> to vector<16x256xi1>
    %35 = vector.broadcast %cst : f32 to vector<16x256xf32>
    %36 = arith.select %34, %32, %35 : vector<16x256xi1>, vector<16x256xf32>
    %37 = arith.truncf %36 : vector<16x256xf32> to vector<16x256xbf16>
    %38 = vector.extract_strided_slice %29 {offsets = [0, 1], sizes = [16, 256], strides = [1, 1]} : vector<16x384xf32> to vector<16x256xf32>
    %39 = arith.truncf %38 : vector<16x256xf32> to vector<16x256xbf16>
    %40 = vector.extract_strided_slice %29 {offsets = [0, 2], sizes = [16, 256], strides = [1, 1]} : vector<16x384xf32> to vector<16x256xf32>
    %cst_10 = arith.constant 0.000000e+00 : f32
    %41 = vector.shape_cast %20 : vector<1x256xi1> to vector<1x256xi1>
    %42 = vector.broadcast %41 : vector<1x256xi1> to vector<16x256xi1>
    %43 = vector.broadcast %cst_10 : f32 to vector<16x256xf32>
    %44 = arith.select %42, %40, %43 : vector<16x256xi1>, vector<16x256xf32>
    %45 = arith.truncf %44 : vector<16x256xf32> to vector<16x256xbf16>
    %46 = vector.extract_strided_slice %29 {offsets = [0, 16], sizes = [16, 256], strides = [1, 1]} : vector<16x384xf32> to vector<16x256xf32>
    %cst_11 = arith.constant 0.000000e+00 : f32
    %47 = vector.shape_cast %18 : vector<1x256xi1> to vector<1x256xi1>
    %48 = vector.broadcast %47 : vector<1x256xi1> to vector<16x256xi1>
    %49 = vector.broadcast %cst_11 : f32 to vector<16x256xf32>
    %50 = arith.select %48, %46, %49 : vector<16x256xi1>, vector<16x256xf32>
    %51 = arith.truncf %50 : vector<16x256xf32> to vector<16x256xbf16>
    %52 = vector.extract_strided_slice %29 {offsets = [0, 17], sizes = [16, 256], strides = [1, 1]} : vector<16x384xf32> to vector<16x256xf32>
    %53 = arith.truncf %52 : vector<16x256xf32> to vector<16x256xbf16>
    %54 = vector.extract_strided_slice %29 {offsets = [0, 18], sizes = [16, 256], strides = [1, 1]} : vector<16x384xf32> to vector<16x256xf32>
    %cst_12 = arith.constant 0.000000e+00 : f32
    %55 = vector.shape_cast %20 : vector<1x256xi1> to vector<1x256xi1>
    %56 = vector.broadcast %55 : vector<1x256xi1> to vector<16x256xi1>
    %57 = vector.broadcast %cst_12 : f32 to vector<16x256xf32>
    %58 = arith.select %56, %54, %57 : vector<16x256xi1>, vector<16x256xf32>
    %59 = arith.truncf %58 : vector<16x256xf32> to vector<16x256xbf16>
    %60 = vector.extract_strided_slice %29 {offsets = [0, 32], sizes = [16, 256], strides = [1, 1]} : vector<16x384xf32> to vector<16x256xf32>
    %cst_13 = arith.constant 0.000000e+00 : f32
    %61 = vector.shape_cast %18 : vector<1x256xi1> to vector<1x256xi1>
    %62 = vector.broadcast %61 : vector<1x256xi1> to vector<16x256xi1>
    %63 = vector.broadcast %cst_13 : f32 to vector<16x256xf32>
    %64 = arith.select %62, %60, %63 : vector<16x256xi1>, vector<16x256xf32>
    %65 = arith.truncf %64 : vector<16x256xf32> to vector<16x256xbf16>
    %66 = vector.extract_strided_slice %29 {offsets = [0, 33], sizes = [16, 256], strides = [1, 1]} : vector<16x384xf32> to vector<16x256xf32>
    %67 = arith.truncf %66 : vector<16x256xf32> to vector<16x256xbf16>
    %68 = vector.extract_strided_slice %29 {offsets = [0, 34], sizes = [16, 256], strides = [1, 1]} : vector<16x384xf32> to vector<16x256xf32>
    %cst_14 = arith.constant 0.000000e+00 : f32
    %69 = vector.shape_cast %20 : vector<1x256xi1> to vector<1x256xi1>
    %70 = vector.broadcast %69 : vector<1x256xi1> to vector<16x256xi1>
    %71 = vector.broadcast %cst_14 : f32 to vector<16x256xf32>
    %72 = arith.select %70, %68, %71 : vector<16x256xi1>, vector<16x256xf32>
    %73 = arith.truncf %72 : vector<16x256xf32> to vector<16x256xbf16>
    %74 = tpu.concatenate %37, %39, %45, %51, %53, %59, %65, %67, %73 in 0 : vector<16x256xbf16>, vector<16x256xbf16>, vector<16x256xbf16>, vector<16x256xbf16>, vector<16x256xbf16>, vector<16x256xbf16>, vector<16x256xbf16>, vector<16x256xbf16>, vector<16x256xbf16> -> vector<144x256xbf16>
    %cst_15 = arith.constant dense<0.000000e+00> : vector<16x256xf32>
    %75 = tpu.matmul %31, %74, %cst_15 {dimension_numbers = #tpu.dot_dimension_numbers<[1], [0], [0], [1], [0, 0, 1, 1], [], []>} : vector<16x144xbf16>, vector<144x256xbf16>, vector<16x256xf32> -> vector<16x256xf32>
    %76 = vector.broadcast %22 : vector<16x1xf32> to vector<16x256xf32>
    %77 = arith.mulf %75, %76 : vector<16x256xf32>
    %78 = vector.broadcast %23 : vector<16x1xf32> to vector<16x256xf32>
    %79 = arith.addf %77, %78 : vector<16x256xf32>
    %cst_16 = arith.constant 0.000000e+00 : f32
    %80 = vector.broadcast %cst_16 : f32 to vector<16x256xf32>
    %81 = arith.maximumf %79, %80 : vector<16x256xf32>
    %cst_17 = arith.constant 0.000000e+00 : f32
    %82 = vector.broadcast %cst_17 : f32 to vector<16x17xf32>
    %83 = tpu.concatenate %82, %81, %82 in 1 : vector<16x17xf32>, vector<16x256xf32>, vector<16x17xf32> -> vector<16x290xf32>
    %c0_18 = arith.constant 0 : index
    %c0_19 = arith.constant 0 : index
    %84 = vector.load %arg3[%c0_18, %c0_19] : memref<16x144xbf16, #tpu.memory_space<vmem>>, vector<16x144xbf16>
    %85 = vector.extract_strided_slice %83 {offsets = [0, 0], sizes = [16, 256], strides = [1, 1]} : vector<16x290xf32> to vector<16x256xf32>
    %cst_20 = arith.constant 0.000000e+00 : f32
    %86 = vector.shape_cast %18 : vector<1x256xi1> to vector<1x256xi1>
    %87 = vector.broadcast %86 : vector<1x256xi1> to vector<16x256xi1>
    %88 = vector.broadcast %cst_20 : f32 to vector<16x256xf32>
    %89 = arith.select %87, %85, %88 : vector<16x256xi1>, vector<16x256xf32>
    %90 = arith.truncf %89 : vector<16x256xf32> to vector<16x256xbf16>
    %91 = vector.extract_strided_slice %83 {offsets = [0, 1], sizes = [16, 256], strides = [1, 1]} : vector<16x290xf32> to vector<16x256xf32>
    %92 = arith.truncf %91 : vector<16x256xf32> to vector<16x256xbf16>
    %93 = vector.extract_strided_slice %83 {offsets = [0, 2], sizes = [16, 256], strides = [1, 1]} : vector<16x290xf32> to vector<16x256xf32>
    %cst_21 = arith.constant 0.000000e+00 : f32
    %94 = vector.shape_cast %20 : vector<1x256xi1> to vector<1x256xi1>
    %95 = vector.broadcast %94 : vector<1x256xi1> to vector<16x256xi1>
    %96 = vector.broadcast %cst_21 : f32 to vector<16x256xf32>
    %97 = arith.select %95, %93, %96 : vector<16x256xi1>, vector<16x256xf32>
    %98 = arith.truncf %97 : vector<16x256xf32> to vector<16x256xbf16>
    %99 = vector.extract_strided_slice %83 {offsets = [0, 16], sizes = [16, 256], strides = [1, 1]} : vector<16x290xf32> to vector<16x256xf32>
    %cst_22 = arith.constant 0.000000e+00 : f32
    %100 = vector.shape_cast %18 : vector<1x256xi1> to vector<1x256xi1>
    %101 = vector.broadcast %100 : vector<1x256xi1> to vector<16x256xi1>
    %102 = vector.broadcast %cst_22 : f32 to vector<16x256xf32>
    %103 = arith.select %101, %99, %102 : vector<16x256xi1>, vector<16x256xf32>
    %104 = arith.truncf %103 : vector<16x256xf32> to vector<16x256xbf16>
    %105 = vector.extract_strided_slice %83 {offsets = [0, 17], sizes = [16, 256], strides = [1, 1]} : vector<16x290xf32> to vector<16x256xf32>
    %106 = arith.truncf %105 : vector<16x256xf32> to vector<16x256xbf16>
    %107 = vector.extract_strided_slice %83 {offsets = [0, 18], sizes = [16, 256], strides = [1, 1]} : vector<16x290xf32> to vector<16x256xf32>
    %cst_23 = arith.constant 0.000000e+00 : f32
    %108 = vector.shape_cast %20 : vector<1x256xi1> to vector<1x256xi1>
    %109 = vector.broadcast %108 : vector<1x256xi1> to vector<16x256xi1>
    %110 = vector.broadcast %cst_23 : f32 to vector<16x256xf32>
    %111 = arith.select %109, %107, %110 : vector<16x256xi1>, vector<16x256xf32>
    %112 = arith.truncf %111 : vector<16x256xf32> to vector<16x256xbf16>
    %113 = vector.extract_strided_slice %83 {offsets = [0, 32], sizes = [16, 256], strides = [1, 1]} : vector<16x290xf32> to vector<16x256xf32>
    %cst_24 = arith.constant 0.000000e+00 : f32
    %114 = vector.shape_cast %18 : vector<1x256xi1> to vector<1x256xi1>
    %115 = vector.broadcast %114 : vector<1x256xi1> to vector<16x256xi1>
    %116 = vector.broadcast %cst_24 : f32 to vector<16x256xf32>
    %117 = arith.select %115, %113, %116 : vector<16x256xi1>, vector<16x256xf32>
    %118 = arith.truncf %117 : vector<16x256xf32> to vector<16x256xbf16>
    %119 = vector.extract_strided_slice %83 {offsets = [0, 33], sizes = [16, 256], strides = [1, 1]} : vector<16x290xf32> to vector<16x256xf32>
    %120 = arith.truncf %119 : vector<16x256xf32> to vector<16x256xbf16>
    %121 = vector.extract_strided_slice %83 {offsets = [0, 34], sizes = [16, 256], strides = [1, 1]} : vector<16x290xf32> to vector<16x256xf32>
    %cst_25 = arith.constant 0.000000e+00 : f32
    %122 = vector.shape_cast %20 : vector<1x256xi1> to vector<1x256xi1>
    %123 = vector.broadcast %122 : vector<1x256xi1> to vector<16x256xi1>
    %124 = vector.broadcast %cst_25 : f32 to vector<16x256xf32>
    %125 = arith.select %123, %121, %124 : vector<16x256xi1>, vector<16x256xf32>
    %126 = arith.truncf %125 : vector<16x256xf32> to vector<16x256xbf16>
    %127 = tpu.concatenate %90, %92, %98, %104, %106, %112, %118, %120, %126 in 0 : vector<16x256xbf16>, vector<16x256xbf16>, vector<16x256xbf16>, vector<16x256xbf16>, vector<16x256xbf16>, vector<16x256xbf16>, vector<16x256xbf16>, vector<16x256xbf16>, vector<16x256xbf16> -> vector<144x256xbf16>
    %cst_26 = arith.constant dense<0.000000e+00> : vector<16x256xf32>
    %128 = tpu.matmul %84, %127, %cst_26 {dimension_numbers = #tpu.dot_dimension_numbers<[1], [0], [0], [1], [0, 0, 1, 1], [], []>} : vector<16x144xbf16>, vector<144x256xbf16>, vector<16x256xf32> -> vector<16x256xf32>
    %129 = vector.broadcast %24 : vector<16x1xf32> to vector<16x256xf32>
    %130 = arith.mulf %128, %129 : vector<16x256xf32>
    %131 = vector.broadcast %25 : vector<16x1xf32> to vector<16x256xf32>
    %132 = arith.addf %130, %131 : vector<16x256xf32>
    %cst_27 = arith.constant dense<0.000000e+00> : vector<16xf32>
    %133 = vector.multi_reduction <add>, %132, %cst_27 [1] : vector<16x256xf32> to vector<16xf32>
    %134 = vector.shape_cast %133 : vector<16xf32> to vector<16x1xf32>
    %cst_28 = arith.constant 3.906250e-03 : f32
    %135 = vector.broadcast %cst_28 : f32 to vector<16x1xf32>
    %136 = arith.mulf %134, %135 : vector<16x1xf32>
    %137 = vector.broadcast %136 : vector<16x1xf32> to vector<16x4xf32>
    %138 = arith.mulf %26, %137 : vector<16x4xf32>
    %cst_29 = arith.constant dense<0.000000e+00> : vector<4xf32>
    %139 = vector.multi_reduction <add>, %138, %cst_29 [0] : vector<16x4xf32> to vector<4xf32>
    %140 = vector.shape_cast %139 : vector<4xf32> to vector<1x4xf32>
    %cst_30 = arith.constant 0.000000e+00 : f32
    %141 = vector.broadcast %cst_30 : f32 to vector<1x4xf32>
    %142 = arith.maximumf %140, %141 : vector<1x4xf32>
    %143 = vector.broadcast %142 : vector<1x4xf32> to vector<16x4xf32>
    %144 = arith.mulf %27, %143 : vector<16x4xf32>
    %cst_31 = arith.constant dense<0.000000e+00> : vector<16xf32>
    %145 = vector.multi_reduction <add>, %144, %cst_31 [1] : vector<16x4xf32> to vector<16xf32>
    %146 = vector.shape_cast %145 : vector<16xf32> to vector<16x1xf32>
    %147 = arith.negf %146 : vector<16x1xf32>
    %148 = math.exp %147 : vector<16x1xf32>
    %cst_32 = arith.constant 1.000000e+00 : f32
    %149 = vector.broadcast %cst_32 : f32 to vector<16x1xf32>
    %150 = arith.addf %149, %148 : vector<16x1xf32>
    %151 = arith.divf %149, %150 : vector<16x1xf32>
    %152 = vector.broadcast %151 : vector<16x1xf32> to vector<16x256xf32>
    %153 = arith.mulf %132, %152 : vector<16x256xf32>
    %154 = arith.addf %153, %30 : vector<16x256xf32>
    %cst_33 = arith.constant 0.000000e+00 : f32
    %155 = vector.broadcast %cst_33 : f32 to vector<16x256xf32>
    %156 = arith.maximumf %154, %155 : vector<16x256xf32>
    %c0_34 = arith.constant 0 : index
    %c0_35 = arith.constant 0 : index
    %c0_36 = arith.constant 0 : index
    %157 = vector.load %arg5[%c0_34, %c0_35, %c0_36] : memref<1x16x256xf32, #tpu.memory_space<vmem>>, vector<1x16x256xf32>
    %158 = vector.shape_cast %157 : vector<1x16x256xf32> to vector<16x256xf32>
    %159 = vector.shape_cast %156 : vector<16x256xf32> to vector<1x16x256xf32>
    tpu.vector_store %arg5[%c0_34, %c0_35, %c0_36], %159 {strides = array<i32>} : memref<1x16x256xf32, #tpu.memory_space<vmem>>, vector<1x16x256xf32>,
    return
  }
  func.func @transform_0(%arg0: i32) -> (i32, i32, i32) {
    %c0_i32 = arith.constant 0 : i32
    %c0_i32_0 = arith.constant 0 : i32
    %c0_i32_1 = arith.constant 0 : i32
    return %arg0, %c0_i32, %c0_i32_0 : i32, i32, i32
  }
  func.func @transform_1(%arg0: i32) -> (i32, i32) {
    %c0_i32 = arith.constant 0 : i32
    %c0_i32_0 = arith.constant 0 : i32
    %c0_i32_1 = arith.constant 0 : i32
    return %c0_i32, %c0_i32_0 : i32, i32
  }
  func.func @transform_2(%arg0: i32) -> (i32, i32) {
    %c0_i32 = arith.constant 0 : i32
    %c0_i32_0 = arith.constant 0 : i32
    %c0_i32_1 = arith.constant 0 : i32
    return %c0_i32, %c0_i32_0 : i32, i32
  }
  func.func @transform_3(%arg0: i32) -> (i32, i32) {
    %c0_i32 = arith.constant 0 : i32
    %c0_i32_0 = arith.constant 0 : i32
    %c0_i32_1 = arith.constant 0 : i32
    return %c0_i32, %c0_i32_0 : i32, i32
  }
  func.func @transform_4(%arg0: i32) -> (i32, i32, i32) {
    %c0_i32 = arith.constant 0 : i32
    %c0_i32_0 = arith.constant 0 : i32
    %c0_i32_1 = arith.constant 0 : i32
    return %arg0, %c0_i32, %c0_i32_0 : i32, i32, i32
  }
}

</mosaic_0001>

<bundles_post_ra>
// kernel: tpu_custom_call.1
= control target key start
LH: loop header
LB: loop body
LE: loop exit
PB: predicated region body
PF: predicated region fallthrough
CT: control target
= control target key end

     0   :  { %9 = vsyncpa [#allocation3], 0  ;;  %s2221_s0 = inlined_call_operand.hbm [shape: f32[2,16,384], index: 0, kind: input, shape index: {}]   ;;  %s2222_s1 = inlined_call_operand.hbm [shape: bf16[16,144], index: 1, kind: input, shape index: {}]   ;;  %s2223_s2 = inlined_call_operand.hbm [shape: bf16[16,144], index: 2, kind: input, shape index: {}]   ;;  %s2224_s3 = inlined_call_operand.hbm [shape: f32[16,12], index: 3, kind: input, shape index: {}]   ;;  %s2225_s4 = inlined_call_operand.hbm [shape: f32[2,16,256], index: 4, kind: output, shape index: {}]  }
   0x1   :  { %11 = vsyncpa [#allocation3 + $0x1], 0 }
   0x2   :  { %12 = vsyncpa [#allocation6], 0 }
   0x3   :  { %13 = vsyncpa [#allocation9], 0 }
   0x4   :  { %14 = vsyncpa [#allocation4], 0 }
   0x5   :  { %16 = vsyncpa [#allocation4 + $0x1], 0  ;;  %s1693_s15 = smov 0   ;;  %s1695_s16 = smov 0  }
   0x6   :  { %s1697_s17 = smov 0   ;;  %s1699_s18 = smov 0  }
   0x7 LB: > { %s1714_s19 = sadd.s32 4294967295, %s1640_s18   ;;  %s1071_s20 = sadd.s32 4294967294, %s1640_s18   ;;  %s1640_s18 = sphi %s1699_s18, %s2256_s18   ;;  %s1636_s17 = sphi %s1697_s17, %s2255_s17   ;;  %s1632_s16 = sphi %s1695_s16, %s2254_s16   ;;  %s1628_s15 = sphi %s1693_s15, %s2253_s15  }
   0x8   : > { %p42_p0 = scmp.ne.s32.totalorder %s1632_s16, %s1628_s15  ;;  %p2226_p1 = scmp.eq.s32.totalorder %s1714_s19, 0 }
   0x9   : > { %p135_p3 = scmp.eq.s32.totalorder %s1071_s20, 1  ;;  %p1072_p5 = scmp.ge.s32.totalorder %s1640_s18, 1 }
   0xa   : > { %p1723_p4 = por %p2226_p1, %p42_p0  ;;  %p142_p7 = scmp.lt.s32.totalorder %s1640_s18, 3 }
   0xb   : > { %p1728_p6 = por %p135_p3, %p42_p0  ;;  %s1642_s24 = smov [#allocation5]  }
   0xc   : > { %s2229_s21 = scalar_select %p1723_p4, 1, 0 }
   0xd   : > { %s2230_s22 = scalar_select %p1728_p6, 1, 0 }
   0xe   : > { %p1733_p8 = pnand %p1072_p5, %p142_p7  ;;  %s154_s25 = sshll.u32 %s1642_s24, 4  ;;  %s1737_s25 = int_to_ptr.vmem [resolvable:$true] %s154_s25 }
   0xf   : > { %s1643_s27 = smov [#allocation7]   ;;  %s1644_s29 = smov [#allocation8]  }
  0x10   : > { %s2231_s23 = scalar_select %p1733_p8, 1, 0 }
  0x11   : > { %p1188_p9 = pneg %p1733_p8  ;;  %s167_s28 = sshll.u32 %s1643_s27, 4  ;;  %s1748_s28 = int_to_ptr.vmem [resolvable:$true] %s167_s28 }
  0x12   : > { %s1750_s30 = sshll.u32 %s1644_s29, 4  ;;  %s1452_s7 = scalar_lea.hbm %s2222_s1, 256  ;;  %s181_s30 = int_to_ptr.vmem [resolvable:$true] %s1750_s30 }
  0x13   : > { %p1744_p11 = pnand %p1188_p9, %p2226_p1  ;;  %p1453_p12 = scmp.ne.s32.totalorder %s2222_s1, %s1452_s7 }
  0x14   : > { %p1459_p5 = scmp.lt.u32.totalorder %s1452_s7, %s2222_s1 }
  0x15   : > { %p1760_p13 = pneg %p1744_p11 }
  0x17   : > { %p1455_p0 = pnand %p1760_p13, %p1453_p12 }
  0x19   : > { %p1456_p3 = pneg %p1455_p0 }
  0x1b   : > { %p1461_p7 = pnand %p1459_p5, %p1456_p3 }
  0x1d   : > { %1464 = shalt.err (!%p1461_p7)
}
  0x1e   : > { %s1465_s13 = scalar_lea.vmem %s1737_s25, 256  ;;  %p1473_p2 = scmp.lt.s32.totalorder %s1737_s25, %s1737_s25 }
  0x1f   : > { %p1466_p9 = scmp.ne.s32.totalorder %s1737_s25, %s1465_s13  ;;  %p1474_p6 = scmp.lt.s32.totalorder %s1465_s13, %s1465_s13 }
  0x21   : > { %p1468_p10 = pnand %p1466_p9, %p1760_p13  ;;  %p1475_p12 = por %p1474_p6, %p1473_p2 }
  0x23   : > { %p1469_p1 = pneg %p1468_p10 }
  0x25   : > { %p1476_p0 = pnand %p1475_p12, %p1469_p1 }
  0x27   : > { %1479 = shalt.err (!%p1476_p0)
}
  0x28   : > { %s1645_s14 = smov 128   ;;  %s1646_s20 = smov 8  }
  0x29   : > { %1191 = dma.hbm_to_vmem [thread:$0]  (!%p1744_p11), %s2222_s1, 256, %s1737_s25, [#allocation6], %s1645_s14, %s1645_s14, %s1646_s20  }
  0x2a   : > { %s1480_s6 = scalar_lea.hbm %s2223_s2, 256 }
  0x2b   : > { %p1481_p1 = scmp.ne.s32.totalorder %s2223_s2, %s1480_s6  ;;  %p1487_p10 = scmp.lt.u32.totalorder %s1480_s6, %s2223_s2 }
  0x2d   : > { %p1483_p2 = pnand %p1481_p1, %p1760_p13 }
  0x2f   : > { %p1484_p6 = pneg %p1483_p2 }
  0x31   : > { %p1489_p3 = pnand %p1487_p10, %p1484_p6 }
  0x33   : > { %1492 = shalt.err (!%p1489_p3)
}
  0x34   : > { %s1493_s25 = scalar_lea.vmem %s1748_s28, 256  ;;  %p1501_p12 = scmp.lt.s32.totalorder %s1748_s28, %s1748_s28 }
  0x35   : > { %p1494_p5 = scmp.ne.s32.totalorder %s1748_s28, %s1493_s25  ;;  %p1502_p0 = scmp.lt.s32.totalorder %s1493_s25, %s1493_s25 }
  0x37   : > { %p1496_p7 = pnand %p1494_p5, %p1760_p13  ;;  %p1503_p1 = por %p1502_p0, %p1501_p12 }
  0x39   : > { %p1497_p9 = pneg %p1496_p7 }
  0x3b   : > { %p1504_p2 = pnand %p1503_p1, %p1497_p9 }
  0x3d   : > { %1507 = shalt.err (!%p1504_p2)
}
  0x3e   : > { %1194 = dma.hbm_to_vmem [thread:$0]  (!%p1744_p11), %s2223_s2, 256, %s1748_s28, [#allocation6], %s1645_s14, %s1645_s14, %s1646_s20  }
  0x3f   : > { %s1508_s29 = scalar_lea.hbm %s2224_s3, 256 }
  0x40   : > { %p1509_p6 = scmp.ne.s32.totalorder %s2224_s3, %s1508_s29  ;;  %p1515_p5 = scmp.lt.u32.totalorder %s1508_s29, %s2224_s3 }
  0x42   : > { %p1511_p10 = pnand %p1509_p6, %p1760_p13 }
  0x44   : > { %p1512_p3 = pneg %p1511_p10 }
  0x46   : > { %p1517_p7 = pnand %p1515_p5, %p1512_p3 }
  0x48   : > { %1520 = shalt.err (!%p1517_p7)
}
  0x49   : > { %s1521_s9 = scalar_lea.vmem %s181_s30, 256  ;;  %p1529_p1 = scmp.lt.s32.totalorder %s181_s30, %s181_s30 }
  0x4a   : > { %p1522_p9 = scmp.ne.s32.totalorder %s181_s30, %s1521_s9  ;;  %p1530_p2 = scmp.lt.s32.totalorder %s1521_s9, %s1521_s9 }
  0x4c   : > { %p1524_p12 = pnand %p1522_p9, %p1760_p13  ;;  %p1531_p4 = por %p1530_p2, %p1529_p1 }
  0x4e   : > { %p1525_p0 = pneg %p1524_p12 }
  0x50   : > { %p1532_p8 = pnand %p1531_p4, %p1525_p0 }
  0x52   : > { %1535 = shalt.err (!%p1532_p8)
}
  0x53   : > { %1197 = dma.hbm_to_vmem [thread:$0]  (!%p1744_p11), %s2224_s3, 256, %s181_s30, [#allocation9], %s1645_s14, %s1645_s14, %s1646_s20  }
  0x54   : > { %s1833_s10 = sadd.s32 1, %s1640_s18   ;;  %s29_s25 = sadd.s32 1, %s1636_s17 }
  0x55   : > { %s26_s26 = ssub.s32 %s1640_s18, %s1833_s10  ;;  %p36_p8 = scmp.ne.s32.totalorder %s1636_s17, %s1632_s16 }
  0x56   : > { %p27_p4 = scmp.eq.s32.totalorder %s26_s26, 0  ;;  %p37_p13 = scmp.eq.s32.totalorder %s1640_s18, 0 }
  0x57   : > { %p1209_p6 = scmp.lt.s32.totalorder %s1640_s18, 2  ;;  %p2234_p3 = scmp.eq.s32.totalorder %s1714_s19, 1 }
  0x58   : > { %s1843_s12 = scalar_select %p27_p4, %s1636_s17, %s29_s25  }
  0x59   : > { %p38_p10 = por %p37_p13, %p36_p8  ;;  %p1847_p5 = por %p2234_p3, %p36_p8 }
  0x5a   : > { %s194_s24 = sand.u32 1, %s1636_s17   ;;  %s1170_s27 = smul.u32 768, %s1640_s18 }
  0x5b   : > { %s1169_s30 = smul.u32 48, %s194_s24  ;;  %p1858_p11 = pnand %p1209_p6, %p38_p10 }
  0x5c   : > { %s1856_s29 = scalar_lea.hbm %s2221_s0, %s1170_s27  ;;  %s1864_s8 = scalar_lea.sflag [#allocation3], %s194_s24 }
  0x5d   : > { %s198_s6 = scalar_lea.vmem [#allocation2], %s1169_s30  ;;  %s1536_s9 = scalar_lea.hbm %s1856_s29, 768 }
  0x5e   : > { %s205_s7 = sshll.u32 %s198_s6, 4  ;;  %p1537_p7 = scmp.ne.s32.totalorder %s1856_s29, %s1536_s9  ;;  %s1862_s7 = int_to_ptr.vmem [resolvable:$true] %s205_s7 }
  0x5f   : > { %p1538_p9 = pneg %p1858_p11  ;;  %s1541_s26 = scalar_lea.hbm %s2221_s0, 1536 }
  0x60   : > { %p1542_p1 = scmp.lt.u32.totalorder %s1856_s29, %s2221_s0  ;;  %p1543_p2 = scmp.lt.u32.totalorder %s1541_s26, %s1536_s9 }
  0x61   : > { %p1539_p12 = pnand %p1538_p9, %p1537_p7  ;;  %p1545_p8 = scmp.lt.u32.totalorder %s1536_s9, %s1856_s29 }
  0x62   : > { %p1544_p4 = por %p1543_p2, %p1542_p1 }
  0x63   : > { %p1540_p0 = pneg %p1539_p12 }
  0x64   : > { %p1546_p13 = por %p1545_p8, %p1544_p4 }
  0x66   : > { %p1547_p6 = pnand %p1546_p13, %p1540_p0 }
  0x68   : > { %1550 = shalt.err (!%p1547_p6)
}
  0x69   : > { %s1551_s24 = scalar_lea.vmem %s1862_s7, 768  ;;  %s1647_s30 = smov [#allocation2]  }
  0x6a   : > { %p1552_p10 = scmp.ne.s32.totalorder %s1862_s7, %s1551_s24  ;;  %s1556_s14 = sshll.u32 %s1647_s30, 4  ;;  %s1557_s14 = int_to_ptr.vmem [resolvable:$false] %s1556_s14 }
  0x6b   : > { %s1558_s20 = scalar_lea.vmem %s1557_s14, 1536  ;;  %p1559_p12 = scmp.lt.s32.totalorder %s1862_s7, %s1557_s14 }
  0x6c   : > { %p1554_p3 = pnand %p1552_p10, %p1538_p9  ;;  %p1560_p1 = scmp.lt.s32.totalorder %s1558_s20, %s1551_s24 }
  0x6e   : > { %p1555_p7 = pneg %p1554_p3  ;;  %p1561_p2 = por %p1560_p1, %p1559_p12 }
  0x70   : > { %p1562_p4 = pnand %p1561_p2, %p1555_p7 }
  0x72   : > { %1565 = shalt.err (!%p1562_p4)
}
  0x73   : > { %s1648_s6 = smov 384   ;;  %s1649_s9 = smov 24  }
  0x74   : > { %1201 = dma.hbm_to_vmem [thread:$0]  (!%p1858_p11), %s1856_s29, 768, %s1862_s7, %s1864_s8, %s1648_s6, %s1648_s6, %s1649_s9  }
  0x75   : > { %p2237_p9 = scmp.ne.s32.totalorder %s2231_s23, 0 }
  0x76   : > { %s1895_s28 = sand.u32 (!%p2237_p9), 1, %s1632_s16   ;;  %p2238_p0 = scmp.ne.s32.totalorder (!%p2237_p9), %s2229_s21, 0 }
  0x77   : > { %217 = sbr.rel (%p2237_p9) target bundleno = 1620 (0x654), region = 36  ;;  %s220_s26 = scalar_lea.sflag (!%p2237_p9), [#allocation3], %s1895_s28 }
  0x78   : > { %s1171_s11 = smul.u32 (!%p2237_p9), 48, %s1895_s28 }
  0x7a   : > { %s223_s25 = scalar_lea.vmem (!%p2237_p9), [#allocation2], %s1171_s11 }
  0x7e   : > { %1611 = dma.done.wait (%p2238_p0), %s220_s26, 768  }
  0x7f   : > { %1613 = vsyncadd (%p2238_p0), %s220_s26, 4294966528  ;;  %p2239_p8 = scmp.eq.s32.totalorder %s1714_s19, 0 }
  0x81   : > { %1615 = dma.done.wait (%p2239_p8), [#allocation6], 512   ;;  %p2240_p11 = pmov %p2239_p8 }
  0x82   : > { %p2241_p13 = pmov %p2239_p8 }
  0x83   : > { %1617 = vsyncadd (%p2240_p11), [#allocation6], 4294966784 }
  0x84   : > { %1619 = dma.done.wait (%p2241_p13), [#allocation9], 256   ;;  %p2242_p6 = pmov %p2239_p8 }
  0x85   : > { %v261_v0 = vlaneseq  ;;  %v1917_v4 = vld [vmem:[%s223_s25 + $0x20] sm:$0xff]  ;;  %v1919_v5 = vld [vmem:[%s223_s25 + $0x28] sm:$0xff]  ;;  %v1925_v8 = vld [vmem:[%s223_s25 + $0x10] sm:$0xff]  ;;  %s1650_s21 = smov 126   ;;  %s1651_s23 = smov 127   ;;  %vm505_vm4 = vcmask 130048  }
  0x86   : > { %1621 = vsyncadd (%p2242_p6), [#allocation9], 4294967040  ;;  %v1921_v6 = vld [vmem:[%s223_s25 + $0x8] sm:$0xff]  ;;  %v1275_v7 = vpack.i.bf16 %v1919_v5, %v1917_v4  ;;  %v1927_v9 = vld [vmem:[%s223_s25] sm:$0xff]  ;;  %v314_v18 = vpack.c.bf16 %v1919_v5, %v1925_v8  ;;  %s1652_s29 = smov 112   ;;  %s1653_s5 = smov 111  }
  0x87   : > { %v1911_v1 = vand.u32 127, %v261_v0  ;;  %v1929_v10 = vld [vmem:[%s223_s25 + $0x18] sm:$0xff]  ;;  %v1270_v12 = vpack.i.bf16 %v1925_v8, %v1921_v6  ;;  %v313_v13 = vpack.c.bf16 %v1917_v4, %v1921_v6  ;;  %s1654_s7 = smov 110   ;;  %s1655_s8 = smov 96   ;;  %v1658_v20 = vmov 0   ;;  %v1983_v21 = vld [vmem:[#allocation8] sm:$0xff] }
  0x88   : > { %1276 = vrot.lane.b32.xlu0 %v1275_v7, %s1650_s21  ;;  %v1280_v14 = vpack.i.bf16 %v1929_v10, %v1927_v9  ;;  %v312_v16 = vpack.c.bf16 %v1929_v10, %v1927_v9  ;;  %s1656_s27 = smov 95   ;;  %v1440_v19 = vld [vmem:[#allocation5 + $0x4] ss:$8 sps:$4 sm:$0xff]   ;;  %s1657_s24 = smov 94   ;;  %1346 = vset.pattern.permute.xlu1 %v1658_v20  ;;  %v1659_v23 = vmov 1   ;;  %vm337_vm5 = vcmask 1031168  }
  0x89   : > { %v1914_v2 = vadd.s32 128, %v1911_v1  ;;  %v268_v3 = vand.u32 15, %v1911_v1  ;;  %1271 = vrot.lane.b32.xlu1 %v1270_v12, %s1650_s21  ;;  %1121 = vmatprep.mubr.msk.bf16.mxu0 %vm505_vm4, %v1440_v19  ;;  %v1985_v22 = vld [vmem:[#allocation8 + $0x8] sm:$0xff]  ;;  %vm469_vm6 = vcmask 1039360   ;;  %vm364_vm10 = vcmask 916480   ;;  %s1660_s30 = smov 17  }
  0x8a   : > { %1345 = vset.pattern.permute.xlu0 %v1658_v20  ;;  %vm480_vm12 = vcmask 908288   ;;  %vm391_vm13 = vcmask 900096   ;;  %vm418_vm14 = vcmask 785408   ;;  %vm491_vm15 = vcmask 777216   ;;  %s1663_s14 = smov 4   ;;  %s1664_s20 = smov 120  }
  0x8b   : > { %v275_v11 = vand.u32 15, %v1914_v2  ;;  %vm288_vm0 = vcmp.ne.s32.totalorder %v268_v3, 0  ;;  %vm290_vm9 = vcmp.ne.s32.totalorder %v268_v3, 15  ;;  %s1082_s6 = sshll.u32 %s1895_s28, 5  ;;  %s1168_s26 = sshll.u32 %s1714_s19, 9 }
  0x8c   : > { %vm1944_vm2 = vmpackc.low %vm288_vm0, %vm288_vm0  ;;  %465 = vrot.lane.b32.xlu0 %v313_v13, %s1651_s23  ;;  %vm445_vm0 = vcmask 769024   ;;  %s259_s9 = scalar_lea.vmem [#allocation10], %s1082_s6  ;;  %s956_s19 = scalar_lea.sflag [#allocation4], %s1895_s28 }
  0x8d   : > { %vm289_vm1 = vcmp.ne.s32.totalorder %v275_v11, 0  ;;  %1281 = vrot.lane.b32.xlu1 %v1280_v14, %s1650_s21  ;;  %vm291_vm7 = vcmp.ne.s32.totalorder %v275_v11, 15  ;;  %vm2007_vm11 = vmpackc.low %vm290_vm9, %vm290_vm9  ;;  %s969_s11 = sshll.u32 %s259_s9, 4  ;;  %s2172_s11 = int_to_ptr.vmem [resolvable:$true] %s969_s11 }
  0x8e   : > { %vm1950_vm3 = vmpackc.low %vm289_vm1, %vm289_vm1  ;;  %vm594_vm1 = vcmask 138240  }
  0x8f   : > { %1087 = vmatprep.subr.msk.bf16.mxu0 %vm1950_vm3, %v313_v13  ;;  %vm1996_vm8 = vmpackc.low %vm291_vm7, %vm291_vm7 }
  0x90   : > { %1090 = vmatpush1.bf16.msk.msra.mxu0 %vm1944_vm2, %v312_v16  ;;  %467 = vrot.lane.b32.xlu0 %v314_v18, %s1651_s23 }
  0x91   : > { %463 = vrot.lane.b32.xlu1 %v312_v16, %s1651_s23 }
  0x94   : > { %1286 = vrot.lane.b32.xlu0 %v1270_v12, %s1652_s29 }
  0x95   : > { %1291 = vrot.lane.b32.xlu1 %v1275_v7, %s1652_s29 }
  0x98   : > { %1296 = vrot.lane.b32.xlu0 %v1280_v14, %s1652_s29 }
  0x99   : > { %476 = vrot.lane.b32.xlu1 %v313_v13, %s1653_s5 }
  0x9c   : > { %478 = vrot.lane.b32.xlu0 %v314_v18, %s1653_s5 }
  0x9d   : > { %474 = vrot.lane.b32.xlu1 %v312_v16, %s1653_s5 }
  0xa0   : > { %1301 = vrot.lane.b32.xlu0 %v1270_v12, %s1654_s7 }
  0xa1   : > { %1306 = vrot.lane.b32.xlu1 %v1275_v7, %s1654_s7 }
  0xa4   : > { %1311 = vrot.lane.b32.xlu0 %v1280_v14, %s1654_s7 }
  0xa5   : > { %1316 = vrot.lane.b32.xlu1 %v1270_v12, %s1655_s8 }
  0xa8   : > { %1321 = vrot.lane.b32.xlu0 %v1275_v7, %s1655_s8 }
  0xa9   : > { %1326 = vrot.lane.b32.xlu1 %v1280_v14, %s1655_s8 }
  0xac   : > { %487 = vrot.lane.b32.xlu0 %v313_v13, %s1656_s27 }
  0xad   : > { %489 = vrot.lane.b32.xlu1 %v314_v18, %s1656_s27 }
  0xb0   : > { %485 = vrot.lane.b32.xlu0 %v312_v16, %s1656_s27 }
  0xb1   : > { %1331 = vrot.lane.b32.xlu1 %v1270_v12, %s1657_s24 }
  0xb4   : > { %1336 = vrot.lane.b32.xlu0 %v1275_v7, %s1657_s24 }
  0xb5   : > { %1341 = vrot.lane.b32.xlu1 %v1280_v14, %s1657_s24 }
  0xb8   : > { %554 = vperm.xlu0 %1345, %v1983_v21  }
  0xb9   : > { %559 = vperm.xlu1 %1346, %v1985_v22  }
  0xbc   : > { %1348 = vset.pattern.permute.xlu0 %v1659_v23 }
  0xbd   : > { %1347 = vset.pattern.permute.xlu1 %v1659_v23  ;;  %571 = vperm.xlu0 %1348, %v1985_v22  }
  0xbe   : > { %567 = vperm.xlu1 %1347, %v1983_v21  }
  0xfa   : > { %v1277_v24 = vpop.permute.xlu0 %1276 }
  0xfb   : > { %v1272_v25 = vpop.permute.xlu1 %1271  ;;  %v1279_v26 = vunpack.i.h.bf16 %v1277_v24  ;;  %v1278_v27 = vunpack.i.l.bf16 %v1277_v24 }
  0xfc   : > { %v1274_v28 = vunpack.i.h.bf16 %v1272_v25  ;;  %v1273_v29 = vunpack.i.l.bf16 %v1272_v25 }
  0xfd   : > { %v341_v34 = vsel %vm337_vm5, %v1278_v27, %v1279_v26 }
  0xfe   : > { %v466_v30 = vpop.permute.xlu0 %465  ;;  %v339_v35 = vsel %vm337_vm5, %v1273_v29, %v1274_v28 }
  0xff   : > { %v1282_v31 = vpop.permute.xlu1 %1281  ;;  %v1092_v40 = vpack.c.bf16 %v341_v34, %v339_v35 }
 0x100   : > { %v1284_v32 = vunpack.i.h.bf16 %v1282_v31  ;;  %v1283_v33 = vunpack.i.l.bf16 %v1282_v31 }
 0x102   : > { %v468_v36 = vpop.permute.xlu0 %467  ;;  %v340_v41 = vsel %vm337_vm5, %v1284_v32, %v1278_v27  ;;  %v338_v42 = vsel %vm337_vm5, %v1283_v33, %v1273_v29 }
 0x103   : > { %v464_v37 = vpop.permute.xlu1 %463  ;;  %v471_v38 = vsel %vm469_vm6, %v466_v30, %v468_v36  ;;  %v1095_v46 = vpack.c.bf16 %v340_v41, %v338_v42 }
 0x104   : > { %511 = vmatprep.subr.bf16.mxu0 %v471_v38  ;;  %v470_v43 = vsel %vm469_vm6, %v464_v37, %v466_v30 }
 0x105   : > { %512 = vmatpush1.bf16.msra.mxu0 %v470_v43 }
 0x106   : > { %v1287_v44 = vpop.permute.xlu0 %1286  ;;  %1093 = vmatprep.subr.msk.bf16.mxu0 %vm1996_vm8, %v1092_v40 }
 0x107   : > { %v1289_v47 = vunpack.i.h.bf16 %v1287_v44  ;;  %v1288_v48 = vunpack.i.l.bf16 %v1287_v44  ;;  %v1292_v49 = vpop.permute.xlu1 %1291 }
 0x108   : > { %v1294_v50 = vunpack.i.h.bf16 %v1292_v49  ;;  %v1293_v51 = vunpack.i.l.bf16 %v1292_v49 }
 0x109   : > { %v366_v52 = vsel %vm364_vm10, %v1288_v48, %v1289_v47  ;;  %1096 = vmatpush1.bf16.msk.msra.mxu0 %vm2007_vm11, %v1095_v46 }
 0x10a   : > { %v368_v53 = vsel %vm364_vm10, %v1293_v51, %v1294_v50  ;;  %v1297_v54 = vpop.permute.xlu0 %1296 }
 0x10b   : > { %v1098_v55 = vpack.c.bf16 %v368_v53, %v366_v52  ;;  %v1299_v56 = vunpack.i.h.bf16 %v1297_v54  ;;  %v1298_v57 = vunpack.i.l.bf16 %v1297_v54  ;;  %v477_v58 = vpop.permute.xlu1 %476 }
 0x10d   : > { %v365_v59 = vsel %vm364_vm10, %v1298_v57, %v1288_v48  ;;  %v367_v60 = vsel %vm364_vm10, %v1299_v56, %v1293_v51  ;;  %1099 = vmatprep.subr.msk.bf16.mxu0 %vm1950_vm3, %v1098_v55 }
 0x10e   : > { %v1101_v61 = vpack.c.bf16 %v367_v60, %v365_v59  ;;  %v479_v62 = vpop.permute.xlu0 %478 }
 0x10f   : > { %v475_v63 = vpop.permute.xlu1 %474  ;;  %v482_v0 = vsel %vm480_vm12, %v477_v58, %v479_v62 }
 0x110   : > { %1102 = vmatpush1.bf16.msk.msra.mxu0 %vm1944_vm2, %v1101_v61  ;;  %v481_v11 = vsel %vm480_vm12, %v475_v63, %v477_v58 }
 0x111   : > { %517 = vmatprep.subr.bf16.mxu0 %v482_v0  ;;  %v1438_v0 = vld [vmem:[#allocation5] ss:$8 sps:$4 sm:$0xff]  }
 0x112   : > { %v1302_v1 = vpop.permute.xlu0 %1301 }
 0x113   : > { %v1304_v2 = vunpack.i.h.bf16 %v1302_v1  ;;  %v1303_v3 = vunpack.i.l.bf16 %v1302_v1  ;;  %v1307_v7 = vpop.permute.xlu1 %1306 }
 0x114   : > { %v1309_v12 = vunpack.i.h.bf16 %v1307_v7  ;;  %v1308_v13 = vunpack.i.l.bf16 %v1307_v7  ;;  %518 = vmatpush1.bf16.msra.mxu0 %v481_v11 }
 0x115   : > { %v393_v14 = vsel %vm391_vm13, %v1303_v3, %v1304_v2 }
 0x116   : > { %v395_v16 = vsel %vm391_vm13, %v1308_v13, %v1309_v12  ;;  %v1312_v18 = vpop.permute.xlu0 %1311 }
 0x117   : > { %v1104_v19 = vpack.c.bf16 %v395_v16, %v393_v14  ;;  %v1314_v20 = vunpack.i.h.bf16 %v1312_v18  ;;  %v1313_v23 = vunpack.i.l.bf16 %v1312_v18  ;;  %v1317_v24 = vpop.permute.xlu1 %1316 }
 0x118   : > { %v1319_v27 = vunpack.i.h.bf16 %v1317_v24  ;;  %v1318_v28 = vunpack.i.l.bf16 %v1317_v24 }
 0x119   : > { %v392_v25 = vsel %vm391_vm13, %v1313_v23, %v1303_v3  ;;  %v394_v26 = vsel %vm391_vm13, %v1314_v20, %v1308_v13  ;;  %1105 = vmatprep.subr.msk.bf16.mxu0 %vm1996_vm8, %v1104_v19 }
 0x11a   : > { %v1107_v29 = vpack.c.bf16 %v394_v26, %v392_v25  ;;  %v1322_v30 = vpop.permute.xlu0 %1321  ;;  %v420_v36 = vsel %vm418_vm14, %v1318_v28, %v1319_v27 }
 0x11b   : > { %v1324_v31 = vunpack.i.h.bf16 %v1322_v30  ;;  %v1323_v32 = vunpack.i.l.bf16 %v1322_v30  ;;  %v1327_v33 = vpop.permute.xlu1 %1326 }
 0x11c   : > { %v1329_v34 = vunpack.i.h.bf16 %v1327_v33  ;;  %v1328_v35 = vunpack.i.l.bf16 %v1327_v33  ;;  %1108 = vmatpush1.bf16.msk.msra.mxu0 %vm2007_vm11, %v1107_v29 }
 0x11d   : > { %v422_v37 = vsel %vm418_vm14, %v1323_v32, %v1324_v31 }
 0x11e   : > { %v1110_v38 = vpack.c.bf16 %v422_v37, %v420_v36  ;;  %v421_v40 = vsel %vm418_vm14, %v1329_v34, %v1323_v32  ;;  %v419_v41 = vsel %vm418_vm14, %v1328_v35, %v1318_v28  ;;  %v488_v42 = vpop.permute.xlu0 %487 }
 0x11f   : > { %v1113_v43 = vpack.c.bf16 %v421_v40, %v419_v41  ;;  %v490_v44 = vpop.permute.xlu1 %489 }
 0x120   : > { %1111 = vmatprep.subr.msk.bf16.mxu0 %vm1950_vm3, %v1110_v38  ;;  %v493_v46 = vsel %vm491_vm15, %v488_v42, %v490_v44 }
 0x121   : > { %1114 = vmatpush1.bf16.msk.msra.mxu0 %vm1944_vm2, %v1113_v43 }
 0x122   : > { %v486_v47 = vpop.permute.xlu0 %485  ;;  %523 = vmatprep.subr.bf16.mxu0 %v493_v46 }
 0x123   : > { %v1332_v48 = vpop.permute.xlu1 %1331  ;;  %v492_v49 = vsel %vm491_vm15, %v486_v47, %v488_v42 }
 0x124   : > { %v1334_v50 = vunpack.i.h.bf16 %v1332_v48  ;;  %v1333_v51 = vunpack.i.l.bf16 %v1332_v48 }
 0x125   : > { %524 = vmatpush1.bf16.msra.mxu0 %v492_v49 }
 0x126   : > { %v1337_v52 = vpop.permute.xlu0 %1336  ;;  %v447_v58 = vsel %vm445_vm0, %v1333_v51, %v1334_v50 }
 0x127   : > { %v1339_v53 = vunpack.i.h.bf16 %v1337_v52  ;;  %v1338_v54 = vunpack.i.l.bf16 %v1337_v52  ;;  %v1342_v55 = vpop.permute.xlu1 %1341 }
 0x128   : > { %v1344_v56 = vunpack.i.h.bf16 %v1342_v55  ;;  %v1343_v57 = vunpack.i.l.bf16 %v1342_v55  ;;  %v1662_v55 = vmov 3  }
 0x129   : > { %v449_v59 = vsel %vm445_vm0, %v1338_v54, %v1339_v53  ;;  %v1443_v53 = vld [vmem:[#allocation7 + $0x4] ss:$8 sps:$4 sm:$0xff]  }
 0x12a   : > { %v1116_v60 = vpack.c.bf16 %v449_v59, %v447_v58  ;;  %v448_v61 = vsel %vm445_vm0, %v1344_v56, %v1338_v54  ;;  %v446_v62 = vsel %vm445_vm0, %v1343_v57, %v1333_v51  ;;  %1160 = vmatprep.mubr.msk.bf16.mxu1 %vm505_vm4, %v1443_v53  ;;  %v1661_v54 = vmov 2  }
 0x12b   : > { %v1119_v63 = vpack.c.bf16 %v448_v61, %v446_v62  ;;  %1435 = vset.pattern.permute.xlu1 %v1661_v54  ;;  %1434 = vset.pattern.permute.xlu0 %v1661_v54 }
 0x12c   : > { %1117 = vmatprep.subr.msk.bf16.mxu0 %vm1996_vm8, %v1116_v60 }
 0x12d   : > { %1120 = vmatpush1.bf16.msk.msra.mxu0 %vm2007_vm11, %v1119_v63 }
 0x130   : > { %542 = vmatmul.mubr.bf16.vlgmr.msra.gmra.mrb[0].mxu0 %v1438_v0 }
 0x137   : > { %v555_v2 = vpop.permute.xlu0 %554 }
 0x138   : > { %v560_v1 = vpop.permute.xlu1 %559 }
 0x13c   : > { %v572_v16 = vpop.permute.xlu0 %571 }
 0x13d   : > { %v568_v7 = vpop.permute.xlu1 %567 }
 0x203   : > { %v543_v3 = vpop.f32.mrb[0].mxu0 }
 0x204   : > { %v562_v11 = vmul.f32 %v555_v2, %v543_v3  ;;  %v545_v12 = vpop.f32.mrb[1].mxu0 }
 0x205   : > { %v563_v13 = vmul.f32 %v555_v2, %v545_v12  ;;  %v547_v14 = vpop.f32.mrb[2].mxu0 }
 0x206   : > { %v564_v18 = vmul.f32 %v560_v1, %v547_v14  ;;  %v574_v19 = vadd.f32 %v568_v7, %v562_v11  ;;  %v549_v20 = vpop.f32.mrb[3].mxu0 }
 0x207   : > { %v575_v23 = vadd.f32 %v568_v7, %v563_v13  ;;  %v565_v24 = vmul.f32 %v560_v1, %v549_v20 }
 0x208   : > { %v578_v25 = vmax.f32 %v574_v19, 0.0  ;;  %v576_v26 = vadd.f32 %v572_v16, %v564_v18 }
 0x209   : > { %v579_v27 = vmax.f32 %v575_v23, 0.0  ;;  %v577_v28 = vadd.f32 %v572_v16, %v565_v24 }
 0x20a   : > { %v580_v29 = vmax.f32 %v576_v26, 0.0 }
 0x20b   : > { %v581_v30 = vmax.f32 %v577_v28, 0.0  ;;  %v1349_v31 = vpack.i.bf16 %v579_v27, %v578_v25 }
 0x20d   : > { %1350 = vrot.lane.b32.xlu1 %v1349_v31, %s1660_s30  ;;  %v1354_v32 = vpack.i.bf16 %v581_v30, %v580_v29 }
 0x211   : > { %1355 = vrot.lane.b32.xlu1 %v1354_v32, %s1660_s30 }
 0x27f   : > { %v1351_v33 = vpop.permute.xlu1 %1350 }
 0x280   : > { %v1353_v34 = vunpack.i.h.bf16 %v1351_v33  ;;  %v1352_v35 = vunpack.i.l.bf16 %v1351_v33 }
 0x282   : > { %v605_v36 = vsel %vm594_vm1, %v1353_v34, 0.0  ;;  %v595_v37 = vsel %vm594_vm1, %v1352_v35, %v1353_v34  ;;  %v603_v43 = vsel %vm594_vm1, 0.0, %v1352_v35 }
 0x283   : > { %v1356_v38 = vpop.permute.xlu1 %1355  ;;  %v1364_v40 = vpack.i.bf16 %v605_v36, %v595_v37 }
 0x284   : > { %v1358_v41 = vunpack.i.h.bf16 %v1356_v38  ;;  %v1357_v42 = vunpack.i.l.bf16 %v1356_v38 }
 0x285   : > { %1365 = vrot.lane.b32.xlu0 %v1364_v40, %s1652_s29  ;;  %1360 = vrot.lane.b32.xlu1 %v1364_v40, %s1650_s21 }
 0x286   : > { %v596_v44 = vsel %vm594_vm1, %v1357_v42, %v1358_v41  ;;  %v604_v46 = vsel %vm594_vm1, 0.0, %v1357_v42  ;;  %v606_v50 = vsel %vm594_vm1, %v1358_v41, 0.0 }
 0x287   : > { %v1374_v47 = vpack.i.bf16 %v604_v46, %v603_v43  ;;  %v616_v48 = vpack.c.bf16 %v596_v44, %v595_v37  ;;  %v615_v49 = vpack.c.bf16 %v604_v46, %v603_v43  ;;  %v1384_v51 = vpack.i.bf16 %v606_v50, %v596_v44 }
 0x288   : > { %v617_v52 = vpack.c.bf16 %v606_v50, %v605_v36 }
 0x289   : > { %1375 = vrot.lane.b32.xlu0 %v1374_v47, %s1652_s29  ;;  %1370 = vrot.lane.b32.xlu1 %v1374_v47, %s1650_s21 }
 0x28a   : > { %1126 = vmatprep.subr.msk.bf16.mxu1 %vm1950_vm3, %v616_v48 }
 0x28b   : > { %1129 = vmatpush1.bf16.msk.msra.mxu1 %vm1944_vm2, %v615_v49 }
 0x28d   : > { %1385 = vrot.lane.b32.xlu1 %v1384_v51, %s1652_s29  ;;  %1380 = vrot.lane.b32.xlu0 %v1384_v51, %s1650_s21  ;;  %s1566_s29 = scalar_lea.vmem %s2172_s11, 512 }
 0x28e   : > { %p1567_p10 = scmp.ne.s32.totalorder %s2172_s11, %s1566_s29 }
 0x290   : > { %p1568_p3 = pnand %p1567_p10, %p1847_p5 }
 0x291   : > { %765 = vrot.lane.b32.xlu1 %v615_v49, %s1653_s5  ;;  %755 = vrot.lane.b32.xlu0 %v615_v49, %s1651_s23 }
 0x292   : > { %p1569_p7 = pneg %p1568_p3 }
 0x295   : > { %759 = vrot.lane.b32.xlu1 %v617_v52, %s1651_s23  ;;  %757 = vrot.lane.b32.xlu0 %v616_v48, %s1651_s23  ;;  %s2177_s23 = scalar_lea.hbm %s2225_s4, %s1168_s26 }
 0x299   : > { %1395 = vrot.lane.b32.xlu1 %v1384_v51, %s1654_s7  ;;  %1390 = vrot.lane.b32.xlu0 %v1364_v40, %s1654_s7 }
 0x29d   : > { %1405 = vrot.lane.b32.xlu1 %v1364_v40, %s1655_s8  ;;  %1400 = vrot.lane.b32.xlu0 %v1374_v47, %s1654_s7 }
 0x2a1   : > { %767 = vrot.lane.b32.xlu1 %v616_v48, %s1653_s5  ;;  %769 = vrot.lane.b32.xlu0 %v617_v52, %s1653_s5 }
 0x2a5   : > { %1415 = vrot.lane.b32.xlu1 %v1374_v47, %s1655_s8  ;;  %1410 = vrot.lane.b32.xlu0 %v1384_v51, %s1655_s8 }
 0x2a9   : > { %1420 = vrot.lane.b32.xlu1 %v1364_v40, %s1657_s24  ;;  %775 = vrot.lane.b32.xlu0 %v615_v49, %s1656_s27 }
 0x2ad   : > { %779 = vrot.lane.b32.xlu1 %v617_v52, %s1656_s27  ;;  %777 = vrot.lane.b32.xlu0 %v616_v48, %s1656_s27 }
 0x2b1   : > { %1430 = vrot.lane.b32.xlu1 %v1374_v47, %s1657_s24  ;;  %1425 = vrot.lane.b32.xlu0 %v1384_v51, %s1657_s24 }
 0x2b5   : > { %845 = vperm.xlu1 %1435, %v1985_v22   ;;  %841 = vperm.xlu0 %1434, %v1983_v21  }
 0x2b9   : > { %1436 = vset.pattern.permute.xlu1 %v1662_v55  ;;  %1437 = vset.pattern.permute.xlu0 %v1662_v55 }
 0x2ba   : > { %853 = vperm.xlu1 %1436, %v1983_v21   ;;  %857 = vperm.xlu0 %1437, %v1985_v22  }
 0x2f7   : > { %v1361_v56 = vpop.permute.xlu1 %1360  ;;  %v1366_v57 = vpop.permute.xlu0 %1365 }
 0x2f8   : > { %v1363_v2 = vunpack.i.h.bf16 %v1361_v56  ;;  %v1362_v3 = vunpack.i.l.bf16 %v1361_v56  ;;  %v1368_v13 = vunpack.i.h.bf16 %v1366_v57  ;;  %v1367_v23 = vunpack.i.l.bf16 %v1366_v57 }
 0x2fa   : > { %v635_v20 = vsel %vm337_vm5, %v1362_v3, %v1363_v2  ;;  %v661_v34 = vsel %vm364_vm10, %v1367_v23, %v1368_v13 }
 0x2fb   : > { %v1371_v58 = vpop.permute.xlu1 %1370  ;;  %v1376_v59 = vpop.permute.xlu0 %1375 }
 0x2fc   : > { %v1373_v14 = vunpack.i.h.bf16 %v1371_v58  ;;  %v1372_v16 = vunpack.i.l.bf16 %v1371_v58  ;;  %v1378_v30 = vunpack.i.h.bf16 %v1376_v59  ;;  %v1377_v31 = vunpack.i.l.bf16 %v1376_v59 }
 0x2fe   : > { %v634_v29 = vsel %vm337_vm5, %v1372_v16, %v1362_v3  ;;  %v660_v43 = vsel %vm364_vm10, %v1377_v31, %v1367_v23 }
 0x2ff   : > { %v1386_v60 = vpop.permute.xlu1 %1385  ;;  %v1381_v61 = vpop.permute.xlu0 %1380 }
 0x300   : > { %v1383_v62 = vunpack.i.h.bf16 %v1381_v61  ;;  %v1382_v63 = vunpack.i.l.bf16 %v1381_v61  ;;  %v1388_v7 = vunpack.i.h.bf16 %v1386_v60  ;;  %v1387_v11 = vunpack.i.l.bf16 %v1386_v60 }
 0x302   : > { %v637_v12 = vsel %vm337_vm5, %v1382_v63, %v1383_v62  ;;  %v636_v26 = vsel %vm337_vm5, %v1373_v14, %v1382_v63  ;;  %v663_v28 = vsel %vm364_vm10, %v1387_v11, %v1388_v7  ;;  %v662_v36 = vsel %vm364_vm10, %v1378_v30, %v1387_v11 }
 0x303   : > { %v766_v0 = vpop.permute.xlu1 %765  ;;  %v756_v1 = vpop.permute.xlu0 %755  ;;  %v1131_v27 = vpack.c.bf16 %v637_v12, %v635_v20  ;;  %v1134_v35 = vpack.c.bf16 %v636_v26, %v634_v29  ;;  %v1137_v37 = vpack.c.bf16 %v663_v28, %v661_v34  ;;  %v1140_v47 = vpack.c.bf16 %v662_v36, %v660_v43 }
 0x307   : > { %v760_v18 = vpop.permute.xlu1 %759  ;;  %v758_v19 = vpop.permute.xlu0 %757 }
 0x308   : > { %v762_v24 = vsel %vm469_vm6, %v758_v19, %v760_v18  ;;  %v761_v25 = vsel %vm469_vm6, %v756_v1, %v758_v19 }
 0x309   : > { %799 = vmatprep.subr.bf16.mxu1 %v762_v24 }
 0x30a   : > { %800 = vmatpush1.bf16.msra.mxu1 %v761_v25 }
 0x30b   : > { %v1396_v32 = vpop.permute.xlu1 %1395  ;;  %v1391_v33 = vpop.permute.xlu0 %1390  ;;  %1132 = vmatprep.subr.msk.bf16.mxu1 %vm1996_vm8, %v1131_v27 }
 0x30c   : > { %v1398_v38 = vunpack.i.h.bf16 %v1396_v32  ;;  %v1397_v40 = vunpack.i.l.bf16 %v1396_v32  ;;  %v1393_v41 = vunpack.i.h.bf16 %v1391_v33  ;;  %v1392_v42 = vunpack.i.l.bf16 %v1391_v33 }
 0x30e   : > { %1135 = vmatpush1.bf16.msk.msra.mxu1 %vm2007_vm11, %v1134_v35  ;;  %v689_v50 = vsel %vm391_vm13, %v1397_v40, %v1398_v38  ;;  %v687_v51 = vsel %vm391_vm13, %v1392_v42, %v1393_v41  ;;  %v1441_v38 = vld [vmem:[#allocation7] ss:$8 sps:$4 sm:$0xff]  }
 0x30f   : > { %v1406_v44 = vpop.permute.xlu1 %1405  ;;  %v1401_v46 = vpop.permute.xlu0 %1400  ;;  %1138 = vmatprep.subr.msk.bf16.mxu1 %vm1950_vm3, %v1137_v37  ;;  %v1143_v58 = vpack.c.bf16 %v689_v50, %v687_v51 }
 0x310   : > { %v1403_v48 = vunpack.i.h.bf16 %v1401_v46  ;;  %v1402_v49 = vunpack.i.l.bf16 %v1401_v46  ;;  %v1408_v59 = vunpack.i.h.bf16 %v1406_v44  ;;  %v1407_v60 = vunpack.i.l.bf16 %v1406_v44 }
 0x312   : > { %1141 = vmatpush1.bf16.msk.msra.mxu1 %vm1944_vm2, %v1140_v47  ;;  %v688_v54 = vsel %vm391_vm13, %v1403_v48, %v1397_v40  ;;  %v686_v55 = vsel %vm391_vm13, %v1402_v49, %v1392_v42  ;;  %v713_v11 = vsel %vm418_vm14, %v1407_v60, %v1408_v59 }
 0x313   : > { %v768_v52 = vpop.permute.xlu1 %767  ;;  %v770_v53 = vpop.permute.xlu0 %769  ;;  %v1146_v61 = vpack.c.bf16 %v688_v54, %v686_v55 }
 0x314   : > { %v772_v56 = vsel %vm480_vm12, %v768_v52, %v770_v53  ;;  %v771_v57 = vsel %vm480_vm12, %v766_v0, %v768_v52 }
 0x315   : > { %805 = vmatprep.subr.bf16.mxu1 %v772_v56 }
 0x316   : > { %806 = vmatpush1.bf16.msra.mxu1 %v771_v57 }
 0x317   : > { %v1416_v62 = vpop.permute.xlu1 %1415  ;;  %v1411_v63 = vpop.permute.xlu0 %1410  ;;  %1144 = vmatprep.subr.msk.bf16.mxu1 %vm1996_vm8, %v1143_v58 }
 0x318   : > { %v1418_v1 = vunpack.i.h.bf16 %v1416_v62  ;;  %v1417_v2 = vunpack.i.l.bf16 %v1416_v62  ;;  %v1413_v3 = vunpack.i.h.bf16 %v1411_v63  ;;  %v1412_v7 = vunpack.i.l.bf16 %v1411_v63 }
 0x31a   : > { %v712_v12 = vsel %vm418_vm14, %v1417_v2, %v1407_v60  ;;  %v714_v0 = vsel %vm418_vm14, %v1418_v1, %v1412_v7  ;;  %v715_v13 = vsel %vm418_vm14, %v1412_v7, %v1413_v3  ;;  %1147 = vmatpush1.bf16.msk.msra.mxu1 %vm2007_vm11, %v1146_v61 }
 0x31b   : > { %v1149_v14 = vpack.c.bf16 %v715_v13, %v713_v11  ;;  %v1152_v16 = vpack.c.bf16 %v714_v0, %v712_v12  ;;  %v1421_v18 = vpop.permute.xlu1 %1420  ;;  %v776_v19 = vpop.permute.xlu0 %775 }
 0x31c   : > { %v1423_v26 = vunpack.i.h.bf16 %v1421_v18  ;;  %v1422_v27 = vunpack.i.l.bf16 %v1421_v18 }
 0x31d   : > { %1150 = vmatprep.subr.msk.bf16.mxu1 %vm1950_vm3, %v1149_v14  ;;  %vm899_vm3 = vcmask 31744  }
 0x31e   : > { %1153 = vmatpush1.bf16.msk.msra.mxu1 %vm1944_vm2, %v1152_v16  ;;  %v739_v33 = vsel %vm445_vm0, %v1422_v27, %v1423_v26  ;;  %vm874_vm2 = vcmask 64544  }
 0x31f   : > { %v780_v20 = vpop.permute.xlu1 %779  ;;  %v778_v23 = vpop.permute.xlu0 %777 }
 0x320   : > { %v782_v24 = vsel %vm491_vm15, %v778_v23, %v780_v20  ;;  %v781_v25 = vsel %vm491_vm15, %v776_v19, %v778_v23 }
 0x321   : > { %811 = vmatprep.subr.bf16.mxu1 %v782_v24 }
 0x322   : > { %812 = vmatpush1.bf16.msra.mxu1 %v781_v25 }
 0x323   : > { %v1431_v28 = vpop.permute.xlu1 %1430  ;;  %v1426_v29 = vpop.permute.xlu0 %1425 }
 0x324   : > { %v1433_v30 = vunpack.i.h.bf16 %v1431_v28  ;;  %v1432_v31 = vunpack.i.l.bf16 %v1431_v28  ;;  %v1428_v32 = vunpack.i.h.bf16 %v1426_v29  ;;  %v1427_v17 = vunpack.i.l.bf16 %v1426_v29 }
 0x326   : > { %v738_v15 = vsel %vm445_vm0, %v1432_v31, %v1422_v27  ;;  %v740_v34 = vsel %vm445_vm0, %v1433_v30, %v1427_v17  ;;  %v741_v35 = vsel %vm445_vm0, %v1427_v17, %v1428_v32 }
 0x327   : > { %v1155_v36 = vpack.c.bf16 %v741_v35, %v739_v33  ;;  %v1158_v37 = vpack.c.bf16 %v740_v34, %v738_v15 }
 0x329   : > { %1156 = vmatprep.subr.msk.bf16.mxu1 %vm1996_vm8, %v1155_v36 }
 0x32a   : > { %1159 = vmatpush1.bf16.msk.msra.mxu1 %vm2007_vm11, %v1158_v37 }
 0x32d   : > { %830 = vmatmul.mubr.bf16.vlgmr.msra.gmra.mrb[0].mxu1 %v1441_v38 }
 0x334   : > { %v846_v40 = vpop.permute.xlu1 %845  ;;  %v842_v41 = vpop.permute.xlu0 %841 }
 0x339   : > { %v854_v43 = vpop.permute.xlu1 %853  ;;  %v858_v49 = vpop.permute.xlu0 %857 }
 0x400   : > { %v831_v42 = vpop.f32.mrb[0].mxu1 }
 0x401   : > { %v848_v44 = vmul.f32 %v842_v41, %v831_v42  ;;  %v833_v46 = vpop.f32.mrb[1].mxu1 }
 0x402   : > { %v849_v47 = vmul.f32 %v842_v41, %v833_v46  ;;  %v835_v48 = vpop.f32.mrb[2].mxu1 }
 0x403   : > { %v2134_v50 = vadd.f32 %v854_v43, %v848_v44  ;;  %v850_v51 = vmul.f32 %v846_v40, %v835_v48  ;;  %v837_v52 = vpop.f32.mrb[3].mxu1 }
 0x404   : > { %v2136_v39 = vadd.f32 %v854_v43, %v849_v47  ;;  %v851_v53 = vmul.f32 %v846_v40, %v837_v52 }
 0x405   : > { %v2138_v54 = vadd.f32 %v858_v49, %v850_v51 }
 0x406   : > { %v2140_v45 = vadd.f32 %v858_v49, %v851_v53  ;;  %v864_v55 = vadd.f32 %v2136_v39, %v2134_v50 }
 0x408   : > { %865 = vadd.xlane.f32.xlu1 %v864_v55  ;;  %v867_v56 = vadd.f32 %v2140_v45, %v2138_v54 }
 0x40a   : > { %868 = vadd.xlane.f32.xlu0 %v867_v56 }
 0x495   : > { %v866_v57 = vpop.xlane.xlu1 %865 }
 0x496   : > { %v870_v58 = vmul.f32 0.00390625, %v866_v57 }
 0x497   : > { %v869_v59 = vpop.xlane.xlu0 %868 }
 0x498   : > { %v872_v60 = vmul.f32 %v870_v58, %v1983_v21  ;;  %v871_v61 = vmul.f32 0.00390625, %v869_v59 }
 0x49a   : > { %v873_v62 = vmul.f32 %v871_v61, %v1985_v22  ;;  %v875_v63 = vsel %vm874_vm2, %v872_v60, 0.0 }
 0x49c   : > { %v876_v1 = vsel %vm874_vm2, %v873_v62, 0.0 }
 0x49d   : > { %v877_v2 = vadd.f32 %v876_v1, %v875_v63 }
 0x49f   : > { %v878_v3 = vrot.slane %v877_v2, 4 }
 0x4a1   : > { %v879_v7 = vadd.f32 %v878_v3, %v877_v2 }
 0x4a3   : > { %v880_v11 = vrot.slane %v879_v7, 2 }
 0x4a5   : > { %v881_v12 = vadd.f32 %v880_v11, %v879_v7 }
 0x4a7   : > { %v882_v0 = vrot.slane %v881_v12, 1 }
 0x4a9   : > { %v883_v13 = vadd.f32 %v882_v0, %v881_v12 }
 0x4ab   : > { %v884_v14 = vmax.f32 %v883_v13, 0.0 }
 0x4ad   : > { %886 = vrot.lane.b32.xlu1 %v884_v14, %s1663_s14 }
 0x51f   : > { %v887_v16 = vpop.permute.xlu1 %886 }
 0x520   : > { %v889_v18 = vmul.f32 %v887_v16, %v1983_v21  ;;  %v890_v19 = vmul.f32 %v887_v16, %v1985_v22 }
 0x522   : > { %895 = vrot.lane.b32.xlu1 %v890_v19, %s1664_s20  ;;  %893 = vrot.lane.b32.xlu0 %v889_v18, %s1664_s20 }
 0x594   : > { %v896_v20 = vpop.permute.xlu1 %895  ;;  %v894_v23 = vpop.permute.xlu0 %893 }
 0x595   : > { %v903_v24 = vsel %vm899_vm3, %v896_v20, 0.0  ;;  %v900_v25 = vsel %vm899_vm3, %v894_v23, 0.0 }
 0x596   : > { %904 = vadd.xlane.f32.xlu0 %v903_v24  ;;  %901 = vadd.xlane.f32.xlu1 %v900_v25 }
 0x5a7   : > { %924 = vrot.lane.b32.xlu1 %v1921_v6, %s1653_s5 }
 0x5ab   : > { %926 = vrot.lane.b32.xlu1 %v1925_v8, %s1653_s5 }
 0x5ac   : > { %922 = vrot.lane.b32.xlu0 %v1927_v9, %s1653_s5 }
 0x5af   : > { %930 = vrot.lane.b32.xlu1 %v1917_v4, %s1653_s5 }
 0x5b0   : > { %928 = vrot.lane.b32.xlu0 %v1929_v10, %s1653_s5 }
 0x5b4   : > { %932 = vrot.lane.b32.xlu0 %v1919_v5, %s1653_s5  ;;  %s1665_s5 = smov [#allocation10]  }
 0x5b5   : > { %s1570_s7 = sshll.u32 %s1665_s5, 4  ;;  %s1571_s7 = int_to_ptr.vmem [resolvable:$false] %s1570_s7 }
 0x5b6   : > { %s1572_s8 = scalar_lea.vmem %s1571_s7, 1024  ;;  %p1573_p12 = scmp.lt.s32.totalorder %s2172_s11, %s1571_s7 }
 0x5b7   : > { %p1574_p1 = scmp.lt.s32.totalorder %s1572_s8, %s1566_s29 }
 0x5b9   : > { %p1575_p2 = por %p1574_p1, %p1573_p12 }
 0x5bb   : > { %p1576_p4 = pnand %p1575_p2, %p1569_p7 }
 0x623   : > { %v902_v21 = vpop.xlane.xlu1 %901  ;;  %v905_v22 = vpop.xlane.xlu0 %904 }
 0x624   : > { %v1161_v26 = vmul.f32 -1.442695, %v902_v21  ;;  %v1162_v6 = vmul.f32 -1.442695, %v905_v22 }
 0x626   : > { %1444 = vpow2.f32 %v1161_v26 }
 0x627   : > { %1446 = vpow2.f32 %v1162_v6  ;;  %v923_v8 = vpop.permute.xlu0 %922  ;;  %v925_v29 = vpop.permute.xlu1 %924 }
 0x628   : > { %v935_v36 = vsel %vm480_vm12, %v923_v8, %v925_v29 }
 0x62b   : > { %v929_v4 = vpop.permute.xlu0 %928  ;;  %v927_v10 = vpop.permute.xlu1 %926 }
 0x62c   : > { %v936_v35 = vsel %vm480_vm12, %v925_v29, %v927_v10 }
 0x62f   : > { %v933_v5 = vpop.permute.xlu0 %932  ;;  %v931_v32 = vpop.permute.xlu1 %930 }
 0x630   : > { %v1445_v27 = vpop.eup %1444  ;;  %v938_v34 = vsel %vm480_vm12, %v931_v32, %v933_v5  ;;  %v937_v42 = vsel %vm480_vm12, %v929_v4, %v931_v32 }
 0x631   : > { %v1447_v28 = vpop.eup %1446  ;;  %v912_v9 = vadd.f32 1.0, %v1445_v27 }
 0x632   : > { %v913_v30 = vadd.f32 1.0, %v1447_v28 }
 0x633   : > { %1448 = vrcp.f32 %v912_v9 }
 0x634   : > { %1450 = vrcp.f32 %v913_v30 }
 0x63d   : > { %v1449_v31 = vpop.eup %1448 }
 0x63e   : > { %v1451_v17 = vpop.eup %1450  ;;  %v919_v33 = vmul.f32 %v1449_v31, %v2136_v39  ;;  %v918_v15 = vmul.f32 %v1449_v31, %v2134_v50 }
 0x63f   : > { %v920_v37 = vmul.f32 %v1451_v17, %v2138_v54  ;;  %v921_v38 = vmul.f32 %v1451_v17, %v2140_v45 }
 0x640   : > { %v944_v40 = vadd.f32 %v936_v35, %v919_v33  ;;  %v943_v41 = vadd.f32 %v935_v36, %v918_v15 }
 0x641   : > { %v945_v43 = vadd.f32 %v937_v42, %v920_v37  ;;  %v946_v44 = vadd.f32 %v938_v34, %v921_v38 }
 0x642   : > { %v948_v46 = vmax.f32 %v944_v40, 0.0  ;;  %v947_v47 = vmax.f32 %v943_v41, 0.0 }
 0x643   : > { %v949_v48 = vmax.f32 %v945_v43, 0.0  ;;  %v950_v49 = vmax.f32 %v946_v44, 0.0 }
 0x644   : > { %952 = vst [vmem:[%s259_s9 + $0x8] sm:$0xff] %v948_v46  ;;  %951 = vst [vmem:[%s259_s9] sm:$0xff] %v947_v47 }
 0x645   : > { %953 = vst [vmem:[%s259_s9 + $0x10] sm:$0xff] %v949_v48  ;;  %954 = vst [vmem:[%s259_s9 + $0x18] sm:$0xff] %v950_v49 }
 0x646   : > { %1579 = shalt.err (!%p1576_p4)
}
 0x647   : > { %s1580_s27 = scalar_lea.hbm %s2177_s23, 512  ;;  %s1584_s14 = scalar_lea.hbm %s2225_s4, 1024 }
 0x648   : > { %p1581_p9 = scmp.ne.s32.totalorder %s2177_s23, %s1580_s27  ;;  %p1585_p11 = scmp.lt.u32.totalorder %s2177_s23, %s2225_s4 }
 0x649   : > { %p1586_p13 = scmp.lt.u32.totalorder %s1584_s14, %s1580_s27  ;;  %p1588_p10 = scmp.lt.u32.totalorder %s1580_s27, %s2177_s23 }
 0x64a   : > { %p1582_p0 = pnand %p1581_p9, %p1847_p5 }
 0x64b   : > { %p1587_p6 = por %p1586_p13, %p1585_p11 }
 0x64c   : > { %p1583_p8 = pneg %p1582_p0 }
 0x64d   : > { %p1589_p3 = por %p1588_p10, %p1587_p6 }
 0x64f   : > { %p1590_p7 = pnand %p1589_p3, %p1583_p8 }
 0x651   : > { %1593 = shalt.err (!%p1590_p7)
}
 0x652   : > { %s1666_s9 = smov 256   ;;  %s1667_s26 = smov 16  }
 0x653   : > { %1186 = dma.vmem_to_hbm [thread:$0]  (%p1847_p5), %s2172_s11, 512, %s2177_s23, %s956_s19, %s1666_s9, %s1666_s9, %s1667_s26  }
 0x654 PF: > { %s984_s25 = sand.u32 1, %s1628_s15   ;;  %p2251_p12 = scmp.ne.s32.totalorder %s2230_s22, 0 }
 0x655   : > { %p2252_p1 = scmp.ge.s32.totalorder %s1640_s18, 2  ;;  %s985_s21 = scalar_lea.sflag [#allocation4], %s984_s25 }
 0x657   : > { %p1203_p2 = pnand %p2252_p1, %p2251_p12 }
 0x659   : > { %1623 = dma.done.wait (!%p1203_p2), %s985_s21, 512  }
 0x65a   : > { %1625 = vsyncadd (!%p1203_p2), %s985_s21, 4294966784  ;;  %p19_p4 = scmp.ge.s32.totalorder %s1833_s10, 4   ;;  %s2253_s15 = smov %s1632_s16 }
 0x65b   : > { %s2254_s16 = smov %s1636_s17  ;;  %s2255_s17 = smov %s1843_s12 }
 0x65c   : > { %s2256_s18 = smov %s1833_s10  ;;  %21 = sbr.rel (!%p19_p4) target bundleno = 7 (0x7), region = 93 }
 0x663   :  { %990 = vsyncpa [#allocation3], 1 }
 0x664   :  { %992 = vsyncpa [#allocation3 + $0x1], 1 }
 0x665   :  { %993 = vsyncpa [#allocation6], 1 }
 0x666   :  { %994 = vsyncpa [#allocation9], 1 }
 0x667   :  { %995 = vsyncpa [#allocation4], 1 }
 0x668   :  { %997 = vsyncpa [#allocation4 + $0x1], 1 }

</bundles_post_ra>
